<compile_context>
chip_gen: v7x
topology: tpu7x:2x2x1
jax: 0.10.0
libtpu: 0.0.40
codegen_flags: <defaults>
</compile_context>

<pallas_src>
import numpy as np
import jax
import jax.numpy as jnp
from jax.experimental import pallas as pl
from jax.experimental.pallas import tpu as pltpu

# ----------------------------- sizes ----------------------------------------
N = 256          # number of events (batch, mapped to lanes)
H = 32           # BSM hidden width  (architecture = [1, H, 1])
NBINS = 8        # BinStepLayer bins (edgebinlist has NBINS+1 edges)
M = 8            # columns of A0/A1/A2 (expected-count vector length)
SLAB = 16        # output slab rows: 0..NBINS-1 = oi, NBINS = f, rest padding
KDIM = H + 2 * NBINS            # 48: contraction dim of the fused dot
COLROWS = 2 * H + 4 * NBINS + SLAB   # 112: packed column-vector params


# ----------------------------- kernel ----------------------------------------
def fused_forward_kernel(x_ref, colpack_ref, wpad_ref, a012_ref, nus_ref,
                         slab_ref, eis_ref):
    """Whole NewModel forward in one gridless shot (batch on the lane axis).

    BSM:          f  = Wout @ sigmoid(W1 @ x + b1) + bout
    BinStepLayer: oi = W2 @ relu(sign(W1b @ x + b1b))
      -> both done as ONE block-diagonal dot  W_pad(16,48) @ [h; s](48,N)
    QuadraticExp: e  = mean(a0,0) + sum(a1*nu,0) + sum(a2*nu^2,0)   (nu and nuR)
    """
    x = x_ref[...]                                               # (1, N)

    # ---- unpack column-vector parameters (one DMA, static aligned slices) ----
    w1f = colpack_ref[0:H, :]                                    # (H, 1)
    b1f = colpack_ref[H:2 * H, :]                                # (H, 1)
    w1b = colpack_ref[2 * H:2 * H + 2 * NBINS, :]                # (2B, 1)
    b1b = colpack_ref[2 * H + 2 * NBINS:2 * H + 4 * NBINS, :]    # (2B, 1)
    bcol = colpack_ref[2 * H + 4 * NBINS:COLROWS, :]             # (SLAB, 1): bout at row NBINS

    # ---- BSM hidden: sigmoid(W1 * x + b1)  (VPU + EUP, f32) ----
    h = jax.nn.sigmoid(w1f * x + b1f)                            # (H, N)

    # ---- BinStep indicators: relu(sign(W1b*x + b1b)) == (z > 0), kept in f32 ----
    z = w1b * x + b1b                                            # (2B, N)
    s = jnp.where(z > 0, 1.0, 0.0)                               # (2B, N), exactly 0/1

    # ---- one block-diagonal MXU dot + bias column -> lane-dense output slab ----
    u = jnp.concatenate([h, s], axis=0)                          # (KDIM, N)
    res = jnp.dot(wpad_ref[...], u,
                  preferred_element_type=jnp.float32)            # (SLAB, N)
    slab_ref[...] = res + bcol                                   # rows 0..7 = oi, row 8 = f

    # ---- QuadraticExpLayer for nu and nuR (scalar nuisance params from SMEM) ----
    a = a012_ref[...]                                            # (6, M): [a0; a1; a2]
    a0m = 0.5 * (a[0:1, :] + a[1:2, :])                          # mean over the 2 rows of a0
    a1 = a[2:4, :]
    a2 = a[4:6, :]
    nu0 = nus_ref[0]; nu1 = nus_ref[1]                           # nu   (SCALE, NORM)
    nr0 = nus_ref[2]; nr1 = nus_ref[3]                           # nuR  (SCALE, NORM)
    ei = (a0m + nu0 * a1[0:1, :] + nu1 * a1[1:2, :]
          + (nu0 * nu0) * a2[0:1, :] + (nu1 * nu1) * a2[1:2, :])
    eir = (a0m + nr0 * a1[0:1, :] + nr1 * a1[1:2, :]
           + (nr0 * nr0) * a2[0:1, :] + (nr1 * nr1) * a2[1:2, :])
    eis_ref[...] = jnp.concatenate([ei, eir], axis=0)            # (2, M)


# ----------------------------- pallas_call wrapper ----------------------------
def run_fused(x_row, colpack, wpad, a012, nus):
    n = x_row.shape[1]
    vmem = pl.BlockSpec(memory_space=pltpu.MemorySpace.VMEM)
    smem = pl.BlockSpec(memory_space=pltpu.MemorySpace.SMEM)
    flops = 2 * SLAB * KDIM * n + 4 * KDIM * n + 24 * M
    bytes_accessed = 4 * (n + int(colpack.size) + int(wpad.size)
                          + int(a012.size) + int(nus.size) + SLAB * n + 2 * M)
    cost = pl.CostEstimate(flops=flops, transcendentals=H * n,
                           bytes_accessed=bytes_accessed)
    return pl.pallas_call(
        fused_forward_kernel,
        out_shape=(jax.ShapeDtypeStruct((SLAB, n), jnp.float32),  # oi/f slab
                   jax.ShapeDtypeStruct((2, M), jnp.float32)),    # [ei; eiR]
        in_specs=[vmem,            # x (1, N)
                  vmem,            # packed column vectors (112, 1)
                  vmem,            # block-diagonal weight (16, 48)
                  vmem,            # a0/a1/a2 packed (6, M)
                  smem],           # nu/nuR scalars (4,)
        out_specs=(vmem, vmem),
        cost_estimate=cost,
    )(x_row, colpack, wpad, a012, nus)


# ----------------------------- jitted model forward ---------------------------
@jax.jit
def new_model_forward(x, params):
    (colpack, wpad, a012, nus, nu_mat, nur_mat, nu0_mat, sigma_mat) = params

    x_row = jnp.reshape(x, (1, -1))                              # (N,1) -> (1,N), lane-dense
    slab, eis = run_fused(x_row, colpack, wpad, a012, nus)

    out_oi = slab[:NBINS, :].T                                   # (N, NBINS), torch layout
    out_f = slab[NBINS, :]                                       # (N,) == torch.squeeze
    out_ei = eis[0:1, :]                                         # (1, M)
    out_eiR = eis[1:2, :]                                        # (1, M)

    nu = jnp.squeeze(nu_mat)                                     # (2,)
    nuR = jnp.squeeze(nur_mat)                                   # (2,)
    nu0 = jnp.squeeze(nu0_mat)                                   # (2,)
    sigma = jnp.squeeze(sigma_mat)                               # (2,)
    return [out_oi, out_ei, out_eiR, out_f, nu, nuR, nu0, sigma]


# ----------------------------- parameter setup -------------------------------
def make_binstep_params(edges):
    """Deterministic BinStepLayer weights (matches the torch __init__ construction)."""
    nb = edges.shape[0] - 1
    w = 100.0
    w1 = np.full((2 * nb, 1), w, dtype=np.float32)               # Linear(1,2nb).weight
    b1 = np.zeros((2 * nb,), dtype=np.float32)
    b1[0] = -w * edges[0]
    for i in range(1, nb):
        b1[2 * i - 1] = -w * edges[i]
        b1[2 * i] = -w * edges[i]
    b1[2 * nb - 1] = -w * edges[nb]
    w2 = np.zeros((nb, 2 * nb), dtype=np.float32)                # Linear(2nb,nb).weight
    w2[0, 0] = 1.0
    for i in range(1, nb):
        w2[i, 2 * i - 1] = 1.0
        w2[i - 1, 2 * i] = -1.0
    w2[nb - 1, 2 * nb - 1] = -1.0
    return w1, b1.reshape(-1, 1), w2


def make_bsm_params(key):
    """torch.nn.Linear default init: U(-1/sqrt(fan_in), 1/sqrt(fan_in))."""
    k1, k2, k3, k4 = jax.random.split(key, 4)
    w1 = jax.random.uniform(k1, (H, 1), jnp.float32, -1.0, 1.0)          # fan_in=1
    b1 = jax.random.uniform(k2, (H, 1), jnp.float32, -1.0, 1.0)
    bound = 1.0 / np.sqrt(H)
    wo = jax.random.uniform(k3, (1, H), jnp.float32, -bound, bound)      # fan_in=H
    bo = jax.random.uniform(k4, (1, 1), jnp.float32, -bound, bound)
    return w1, b1, wo, bo


def pack_weights(w1f, b1f, wof, bof, w1b, b1b, w2b):
    """Host-side packing: one column-vector slab + one block-diagonal MXU weight."""
    colpack = np.zeros((COLROWS, 1), np.float32)
    colpack[0:H] = np.asarray(w1f)
    colpack[H:2 * H] = np.asarray(b1f)
    colpack[2 * H:2 * H + 2 * NBINS] = np.asarray(w1b)
    colpack[2 * H + 2 * NBINS:2 * H + 4 * NBINS] = np.asarray(b1b)
    colpack[2 * H + 4 * NBINS + NBINS, 0] = float(np.asarray(bof).reshape(()))  # bout -> slab row 8

    wpad = np.zeros((SLAB, KDIM), np.float32)
    wpad[NBINS, 0:H] = np.asarray(wof).reshape(-1)               # f row multiplies h
    wpad[0:NBINS, H:H + 2 * NBINS] = np.asarray(w2b)             # oi rows multiply s
    return jnp.asarray(colpack), jnp.asarray(wpad)


# ----------------------------- main -------------------------------------------
if __name__ == "__main__":
    key = jax.random.PRNGKey(0)
    k_x, k_bsm, k_a0, k_a1, k_a2 = jax.random.split(key, 5)

    # events: 1D "pt"-like values in [0, 8)
    x = jax.random.uniform(k_x, (N, 1), jnp.float32, 0.0, 8.0)

    # bin edges (deterministic)
    edgebinlist = np.linspace(0.0, 8.0, NBINS + 1).astype(np.float32)
    w1b, b1b, w2b = make_binstep_params(edgebinlist)

    # BSM MLP params (architecture [1, H, 1], deterministic via PRNGKey)
    w1f, b1f, wof, bof = make_bsm_params(k_bsm)

    # A0/A1/A2 matrices: (2, M) = stacked [SCALE; NORM] coefficient rows
    a0 = jax.random.normal(k_a0, (2, M), jnp.float32) * 0.1 + 1.0
    a1 = jax.random.normal(k_a1, (2, M), jnp.float32) * 0.1
    a2 = jax.random.normal(k_a2, (2, M), jnp.float32) * 0.01

    # nuisance parameter matrices (deterministic; reference draws NU0 from N(.,.05))
    nu_mat = jnp.array([[0.02], [1.03]], jnp.float32)    # NUmatrix   (2,1)
    nur_mat = jnp.array([[0.00], [1.00]], jnp.float32)   # NURmatrix  (2,1)
    nu0_mat = jnp.array([[1.05, 1.00]], jnp.float32)     # NU0matrix  (1,2)
    sigma_mat = jnp.array([[0.05, 0.05]], jnp.float32)   # SIGMAmatrix (1,2)

    # host-side packing (one-time, outside jit)
    colpack, wpad = pack_weights(w1f, b1f, wof, bof, w1b, b1b, w2b)
    a012 = jnp.concatenate([a0, a1, a2], axis=0)                 # (6, M)
    nus = jnp.concatenate([nu_mat.ravel(), nur_mat.ravel()])     # (4,)

    params = (colpack, wpad, a012, nus, nu_mat, nur_mat, nu0_mat, sigma_mat)

    outs = new_model_forward(x, params)
    outs = jax.block_until_ready(outs)
    out_oi, out_ei, out_eiR, out_f = outs[0], outs[1], outs[2], outs[3]

    # shape checks
    assert out_oi.shape == (N, NBINS)
    assert out_ei.shape == (1, M) and out_eiR.shape == (1, M)
    assert out_f.shape == (N,)

    # pure-JAX reference (same f32 math) for a correctness sanity check
    h_r = jax.nn.sigmoid(x @ w1f.T + b1f.T)                      # (N, H)
    f_r = jnp.squeeze(h_r @ wof.T + bof, axis=-1)                # (N,)
    z_r = x @ jnp.asarray(w1b).T + jnp.asarray(b1b).T            # (N, 2B)
    s_r = (z_r > 0).astype(jnp.float32)
    oi_r = s_r @ jnp.asarray(w2b).T                              # (N, NBINS)
    ei_r = (jnp.mean(a0, 0) + jnp.sum(a1 * nu_mat, 0)
            + jnp.sum(a2 * nu_mat ** 2, 0))[None, :]
    eiR_r = (jnp.mean(a0, 0) + jnp.sum(a1 * nur_mat, 0)
             + jnp.sum(a2 * nur_mat ** 2, 0))[None, :]

    np.testing.assert_allclose(np.asarray(out_oi), np.asarray(oi_r), atol=1e-4)
    np.testing.assert_allclose(np.asarray(out_f), np.asarray(f_r), rtol=1e-4, atol=1e-4)
    np.testing.assert_allclose(np.asarray(out_ei), np.asarray(ei_r), rtol=1e-4, atol=1e-5)
    np.testing.assert_allclose(np.asarray(out_eiR), np.asarray(eiR_r), rtol=1e-4, atol=1e-5)

    # TODO(synk): BSM.WeightClipping() is a training-time parameter clamp, not part of forward.
    print("KERNEL_OK")
</pallas_src>

<mosaic_0001>
module attributes {stable_mosaic.version = 11 : i64} {
  func.func @fused_forward_kernel(%arg0: memref<1x256xf32, #tpu.memory_space<vmem>>, %arg1: memref<112x1xf32, #tpu.memory_space<vmem>>, %arg2: memref<16x48xf32, #tpu.memory_space<vmem>>, %arg3: memref<6x8xf32, #tpu.memory_space<vmem>>, %arg4: memref<4xf32, #tpu.memory_space<smem>>, %arg5: memref<16x256xf32, #tpu.memory_space<vmem>>, %arg6: memref<2x8xf32, #tpu.memory_space<vmem>>) attributes {dimension_semantics = [], scalar_prefetch = 0 : i64, scratch_operands = 0 : i64, tpu.core_type = #tpu.core_type<tc>} {
    %c0 = arith.constant 0 : index
    %c0_0 = arith.constant 0 : index
    %0 = vector.load %arg0[%c0, %c0_0] : memref<1x256xf32, #tpu.memory_space<vmem>>, vector<1x256xf32>
    %c0_1 = arith.constant 0 : index
    %c0_2 = arith.constant 0 : index
    %1 = vector.load %arg1[%c0_1, %c0_2] : memref<112x1xf32, #tpu.memory_space<vmem>>, vector<32x1xf32>
    %c32 = arith.constant 32 : index
    %c0_3 = arith.constant 0 : index
    %2 = vector.load %arg1[%c32, %c0_3] : memref<112x1xf32, #tpu.memory_space<vmem>>, vector<32x1xf32>
    %c64 = arith.constant 64 : index
    %c0_4 = arith.constant 0 : index
    %3 = vector.load %arg1[%c64, %c0_4] : memref<112x1xf32, #tpu.memory_space<vmem>>, vector<16x1xf32>
    %c80 = arith.constant 80 : index
    %c0_5 = arith.constant 0 : index
    %4 = vector.load %arg1[%c80, %c0_5] : memref<112x1xf32, #tpu.memory_space<vmem>>, vector<16x1xf32>
    %c96 = arith.constant 96 : index
    %c0_6 = arith.constant 0 : index
    %5 = vector.load %arg1[%c96, %c0_6] : memref<112x1xf32, #tpu.memory_space<vmem>>, vector<16x1xf32>
    %6 = vector.broadcast %1 : vector<32x1xf32> to vector<32x256xf32>
    %7 = vector.broadcast %0 : vector<1x256xf32> to vector<32x256xf32>
    %8 = arith.mulf %6, %7 : vector<32x256xf32>
    %9 = vector.broadcast %2 : vector<32x1xf32> to vector<32x256xf32>
    %10 = arith.addf %8, %9 : vector<32x256xf32>
    %11 = arith.negf %10 : vector<32x256xf32>
    %12 = math.exp %11 : vector<32x256xf32>
    %cst = arith.constant 1.000000e+00 : f32
    %13 = vector.broadcast %cst : f32 to vector<32x256xf32>
    %14 = arith.addf %13, %12 : vector<32x256xf32>
    %15 = arith.divf %13, %14 : vector<32x256xf32>
    %16 = vector.broadcast %3 : vector<16x1xf32> to vector<16x256xf32>
    %17 = vector.broadcast %0 : vector<1x256xf32> to vector<16x256xf32>
    %18 = arith.mulf %16, %17 : vector<16x256xf32>
    %19 = vector.broadcast %4 : vector<16x1xf32> to vector<16x256xf32>
    %20 = arith.addf %18, %19 : vector<16x256xf32>
    %cst_7 = arith.constant 0.000000e+00 : f32
    %21 = vector.broadcast %cst_7 : f32 to vector<16x256xf32>
    %22 = arith.cmpf ogt, %20, %21 : vector<16x256xf32>
    %cst_8 = arith.constant 1.000000e+00 : f32
    %cst_9 = arith.constant 0.000000e+00 : f32
    %23 = vector.broadcast %cst_8 : f32 to vector<16x256xf32>
    %24 = vector.broadcast %cst_9 : f32 to vector<16x256xf32>
    %25 = arith.select %22, %23, %24 : vector<16x256xi1>, vector<16x256xf32>
    %26 = tpu.concatenate %15, %25 in 0 : vector<32x256xf32>, vector<16x256xf32> -> vector<48x256xf32>
    %c0_10 = arith.constant 0 : index
    %c0_11 = arith.constant 0 : index
    %27 = vector.load %arg2[%c0_10, %c0_11] : memref<16x48xf32, #tpu.memory_space<vmem>>, vector<16x48xf32>
    %cst_12 = arith.constant dense<0.000000e+00> : vector<16x256xf32>
    %28 = tpu.matmul %27, %26, %cst_12 {dimension_numbers = #tpu.dot_dimension_numbers<[1], [0], [0], [1], [0, 0, 1, 1], [], []>} : vector<16x48xf32>, vector<48x256xf32>, vector<16x256xf32> -> vector<16x256xf32>
    %29 = vector.broadcast %5 : vector<16x1xf32> to vector<16x256xf32>
    %30 = arith.addf %28, %29 : vector<16x256xf32>
    %c0_13 = arith.constant 0 : index
    %c0_14 = arith.constant 0 : index
    %31 = vector.load %arg5[%c0_13, %c0_14] : memref<16x256xf32, #tpu.memory_space<vmem>>, vector<16x256xf32>
    tpu.vector_store %arg5[%c0_13, %c0_14], %30 {strides = array<i32>} : memref<16x256xf32, #tpu.memory_space<vmem>>, vector<16x256xf32>,
    %c0_15 = arith.constant 0 : index
    %c0_16 = arith.constant 0 : index
    %32 = vector.load %arg3[%c0_15, %c0_16] : memref<6x8xf32, #tpu.memory_space<vmem>>, vector<6x8xf32>
    %33 = vector.extract_strided_slice %32 {offsets = [0, 0], sizes = [1, 8], strides = [1, 1]} : vector<6x8xf32> to vector<1x8xf32>
    %34 = vector.extract_strided_slice %32 {offsets = [1, 0], sizes = [1, 8], strides = [1, 1]} : vector<6x8xf32> to vector<1x8xf32>
    %35 = arith.addf %33, %34 : vector<1x8xf32>
    %cst_17 = arith.constant 5.000000e-01 : f32
    %36 = vector.broadcast %cst_17 : f32 to vector<1x8xf32>
    %37 = arith.mulf %36, %35 : vector<1x8xf32>
    %38 = vector.extract_strided_slice %32 {offsets = [2, 0], sizes = [2, 8], strides = [1, 1]} : vector<6x8xf32> to vector<2x8xf32>
    %39 = vector.extract_strided_slice %32 {offsets = [4, 0], sizes = [2, 8], strides = [1, 1]} : vector<6x8xf32> to vector<2x8xf32>
    %c0_18 = arith.constant 0 : index
    %40 = memref.load %arg4[%c0_18] : memref<4xf32, #tpu.memory_space<smem>>
    %c1 = arith.constant 1 : index
    %41 = memref.load %arg4[%c1] : memref<4xf32, #tpu.memory_space<smem>>
    %c2 = arith.constant 2 : index
    %42 = memref.load %arg4[%c2] : memref<4xf32, #tpu.memory_space<smem>>
    %c3 = arith.constant 3 : index
    %43 = memref.load %arg4[%c3] : memref<4xf32, #tpu.memory_space<smem>>
    %44 = vector.extract_strided_slice %38 {offsets = [0, 0], sizes = [1, 8], strides = [1, 1]} : vector<2x8xf32> to vector<1x8xf32>
    %45 = vector.broadcast %40 : f32 to vector<1x8xf32>
    %46 = arith.mulf %45, %44 : vector<1x8xf32>
    %47 = arith.addf %37, %46 : vector<1x8xf32>
    %48 = vector.extract_strided_slice %38 {offsets = [1, 0], sizes = [1, 8], strides = [1, 1]} : vector<2x8xf32> to vector<1x8xf32>
    %49 = vector.broadcast %41 : f32 to vector<1x8xf32>
    %50 = arith.mulf %49, %48 : vector<1x8xf32>
    %51 = arith.addf %47, %50 : vector<1x8xf32>
    %52 = arith.mulf %40, %40 : f32
    %53 = vector.extract_strided_slice %39 {offsets = [0, 0], sizes = [1, 8], strides = [1, 1]} : vector<2x8xf32> to vector<1x8xf32>
    %54 = vector.broadcast %52 : f32 to vector<1x8xf32>
    %55 = arith.mulf %54, %53 : vector<1x8xf32>
    %56 = arith.addf %51, %55 : vector<1x8xf32>
    %57 = arith.mulf %41, %41 : f32
    %58 = vector.extract_strided_slice %39 {offsets = [1, 0], sizes = [1, 8], strides = [1, 1]} : vector<2x8xf32> to vector<1x8xf32>
    %59 = vector.broadcast %57 : f32 to vector<1x8xf32>
    %60 = arith.mulf %59, %58 : vector<1x8xf32>
    %61 = arith.addf %56, %60 : vector<1x8xf32>
    %62 = vector.extract_strided_slice %38 {offsets = [0, 0], sizes = [1, 8], strides = [1, 1]} : vector<2x8xf32> to vector<1x8xf32>
    %63 = vector.broadcast %42 : f32 to vector<1x8xf32>
    %64 = arith.mulf %63, %62 : vector<1x8xf32>
    %65 = arith.addf %37, %64 : vector<1x8xf32>
    %66 = vector.extract_strided_slice %38 {offsets = [1, 0], sizes = [1, 8], strides = [1, 1]} : vector<2x8xf32> to vector<1x8xf32>
    %67 = vector.broadcast %43 : f32 to vector<1x8xf32>
    %68 = arith.mulf %67, %66 : vector<1x8xf32>
    %69 = arith.addf %65, %68 : vector<1x8xf32>
    %70 = arith.mulf %42, %42 : f32
    %71 = vector.extract_strided_slice %39 {offsets = [0, 0], sizes = [1, 8], strides = [1, 1]} : vector<2x8xf32> to vector<1x8xf32>
    %72 = vector.broadcast %70 : f32 to vector<1x8xf32>
    %73 = arith.mulf %72, %71 : vector<1x8xf32>
    %74 = arith.addf %69, %73 : vector<1x8xf32>
    %75 = arith.mulf %43, %43 : f32
    %76 = vector.extract_strided_slice %39 {offsets = [1, 0], sizes = [1, 8], strides = [1, 1]} : vector<2x8xf32> to vector<1x8xf32>
    %77 = vector.broadcast %75 : f32 to vector<1x8xf32>
    %78 = arith.mulf %77, %76 : vector<1x8xf32>
    %79 = arith.addf %74, %78 : vector<1x8xf32>
    %80 = tpu.concatenate %61, %79 in 0 : vector<1x8xf32>, vector<1x8xf32> -> vector<2x8xf32>
    %c0_19 = arith.constant 0 : index
    %c0_20 = arith.constant 0 : index
    %81 = vector.load %arg6[%c0_19, %c0_20] : memref<2x8xf32, #tpu.memory_space<vmem>>, vector<2x8xf32>
    tpu.vector_store %arg6[%c0_19, %c0_20], %80 {strides = array<i32>} : memref<2x8xf32, #tpu.memory_space<vmem>>, vector<2x8xf32>,
    return
  }
}

</mosaic_0001>

<bundles_post_ra>
// kernel: new_model_forward.1
= control target key start
LH: loop header
LB: loop body
LE: loop exit
PB: predicated region body
PF: predicated region fallthrough
CT: control target
= control target key end

     0   :  { %12 = vsyncpa [#allocation3], 0  ;;  %s598_s0 = inlined_call_operand.vmem [shape: f32[1,256], index: 0, kind: input, shape index: {}]   ;;  %s599_s1 = inlined_call_operand.vmem [shape: f32[112,1], index: 1, kind: input, shape index: {}]   ;;  %s600_s2 = inlined_call_operand.vmem [shape: f32[16,48], index: 2, kind: input, shape index: {}]   ;;  %s601_s3 = inlined_call_operand.vmem [shape: f32[6,8], index: 3, kind: input, shape index: {}]   ;;  %s602_s4 = inlined_call_operand.vmem [shape: f32[4], index: 4, kind: input, shape index: {}]   ;;  %s603_s5 = inlined_call_operand.vmem [shape: f32[16,256], index: 5, kind: output, shape index: {0}]   ;;  %s604_s6 = inlined_call_operand.vmem [shape: f32[2,8], index: 6, kind: output, shape index: {1}]  }
   0x1   :  { %s27_s23 = sshll.u32 %s602_s4, 4  ;;  %s28_s23 = int_to_ptr.vmem [resolvable:$true] %s27_s23 }
   0x2   :  { %s452_s24 = scalar_lea.vmem %s28_s23, 16  ;;  %p457_p1 = scmp.lt.s32.totalorder %s28_s23, %s28_s23 }
   0x3   :  { %p453_p0 = scmp.ne.s32.totalorder %s28_s23, %s452_s24  ;;  %p458_p2 = scmp.lt.s32.totalorder %s452_s24, %s452_s24 }
   0x5   :  { %p459_p3 = por %p458_p2, %p457_p1 }
   0x7   :  { %p460_p4 = pnand %p459_p3, %p453_p0 }
   0x9   :  { %463 = shalt.err (!%p460_p4)
}
   0xa   :  { %s466_s25 = smov [#allocation2]  }
   0xb   :  { %30 = dma.vmem_to_smem %s28_s23, 16, %s466_s25, [#allocation3]  }
   0xc   :  { %464 = dma.done.wait [#allocation3], 16  }
   0xd   :  { %465 = vsyncadd [#allocation3], 4294967280 }
   0xe   :  { %34 = sfence }
   0xf   :  { %v40_v0 = vld [vmem:[%s599_s1 + $0x20] sm:$0xff]  ;;  %v467_v2 = vmov 0   ;;  %v41_v3 = vld [vmem:[%s599_s1 + $0x28] sm:$0xff]  ;;  %v39_v5 = vld [vmem:[%s599_s1 + $0x18] sm:$0xff]  ;;  %v468_v15 = vmov 0.0   ;;  %v71_v16 = vlaneseq  ;;  %vm213_vm6 = vcmask 392192  }
  0x10   :  { %v36_v1 = vld [vmem:[%s599_s1] sm:$0xff]  ;;  %419 = vset.pattern.permute.xlu1 %v467_v2  ;;  %418 = vset.pattern.permute.xlu0 %v467_v2  ;;  %v37_v4 = vld [vmem:[%s599_s1 + $0x8] sm:$0xff]  ;;  %v38_v6 = vld [vmem:[%s599_s1 + $0x10] sm:$0xff]  ;;  %s394_s8 = sld [smem:[#allocation2 + $0x2]]  ;;  %s307_s9 = sld [smem:[#allocation2]]  ;;  %vm366_vm7 = vcmask 1040384  }
  0x11   :  { %91 = vperm.xlu1 %419, %v40_v0   ;;  %52 = vperm.xlu0 %418, %v36_v1   ;;  %v43_v7 = vld [vmem:[%s599_s1 + $0x38] sm:$0xff]  ;;  %v42_v8 = vld [vmem:[%s599_s1 + $0x30] sm:$0xff]  ;;  %v45_v9 = vld [vmem:[%s599_s1 + $0x48] sm:$0xff]  ;;  %v72_v17 = vshrl.u32 %v71_v16, 7  ;;  %s575_s10 = sld [smem:[#allocation2 + $0x3]]  ;;  %s393_s13 = sld [smem:[#allocation2 + $0x1]] }
  0x12   :  { %v44_v10 = vld [vmem:[%s599_s1 + $0x40] sm:$0xff]  ;;  %v47_v11 = vld [vmem:[%s599_s1 + $0x58] sm:$0xff]  ;;  %v46_v12 = vld [vmem:[%s599_s1 + $0x50] sm:$0xff]  ;;  %284 = vmatprep.mubr.f32.mxu0 %v468_v15  ;;  %290 = vmatprep.mubr.f32.mxu1 %v468_v15  ;;  %vm368_vm8 = vcmask 58368  }
  0x13   :  { %v49_v13 = vld [vmem:[%s599_s1 + $0x68] sm:$0xff]  ;;  %v48_v14 = vld [vmem:[%s599_s1 + $0x60] sm:$0xff]  ;;  %v73_v18 = vsub.s32 0, %v72_v17  ;;  %v77_v19 = vsub.s32 1, %v72_v17 }
  0x14   :  { %v35_v20 = vld [vmem:[%s598_s0] sm:$0x3] }
  0x15   :  { %96 = vperm.xlu1 %419, %v41_v3   ;;  %57 = vperm.xlu0 %418, %v37_v4   ;;  %v553_v21 = vrot.slane %v35_v20, %v73_v18  ;;  %v555_v22 = vrot.slane %v35_v20, %v77_v19 }
  0x16   :  { %s323_s14 = smul.f32 %s307_s9, %s307_s9 }
  0x17   :  { %s330_s15 = smul.f32 %s393_s13, %s393_s13 }
  0x19   :  { %67 = vperm.xlu1 %419, %v39_v5   ;;  %62 = vperm.xlu0 %418, %v38_v6  }
  0x1d   :  { %106 = vperm.xlu1 %419, %v43_v7   ;;  %101 = vperm.xlu0 %418, %v42_v8  }
  0x21   :  { %172 = vperm.xlu1 %419, %v45_v9   ;;  %167 = vperm.xlu0 %418, %v44_v10  }
  0x25   :  { %186 = vperm.xlu1 %419, %v47_v11   ;;  %181 = vperm.xlu0 %418, %v46_v12  }
  0x29   :  { %210 = vperm.xlu1 %419, %v49_v13   ;;  %205 = vperm.xlu0 %418, %v48_v14  }
  0x90   :  { %v92_v23 = vpop.permute.xlu1 %91  ;;  %v53_v24 = vpop.permute.xlu0 %52 }
  0x91   :  { %v81_v25 = vmul.f32 %v553_v21, %v53_v24  ;;  %v82_v26 = vmul.f32 %v555_v22, %v53_v24 }
  0x93   :  { %v109_v27 = vadd.f32 %v92_v23, %v81_v25  ;;  %v110_v28 = vadd.f32 %v92_v23, %v82_v26 }
  0x94   :  { %v97_v29 = vpop.permute.xlu1 %96  ;;  %v58_v30 = vpop.permute.xlu0 %57 }
  0x95   :  { %v379_v31 = vmul.f32 -1.442695, %v109_v27  ;;  %v380_v32 = vmul.f32 -1.442695, %v110_v28  ;;  %v83_v33 = vmul.f32 %v553_v21, %v58_v30  ;;  %v84_v34 = vmul.f32 %v555_v22, %v58_v30 }
  0x97   :  { %420 = vpow2.f32 %v379_v31  ;;  %v111_v35 = vadd.f32 %v97_v29, %v83_v33  ;;  %v112_v36 = vadd.f32 %v97_v29, %v84_v34  ;;  %v202_v33 = vld [vmem:[%s600_s2 + $0x8] sm:$0xff]  ;;  %v301_v34 = vld [vmem:[%s601_s3] sm:$0x3f]  ;;  %s356_s3 = smul.f32 %s575_s10, %s575_s10 }
  0x98   :  { %422 = vpow2.f32 %v380_v32  ;;  %v68_v37 = vpop.permute.xlu1 %67  ;;  %v63_v38 = vpop.permute.xlu0 %62 }
  0x99   :  { %v381_v39 = vmul.f32 -1.442695, %v111_v35  ;;  %v382_v40 = vmul.f32 -1.442695, %v112_v36  ;;  %v87_v41 = vmul.f32 %v553_v21, %v68_v37  ;;  %v88_v42 = vmul.f32 %v555_v22, %v68_v37 }
  0x9a   :  { %v85_v43 = vmul.f32 %v553_v21, %v63_v38  ;;  %v86_v44 = vmul.f32 %v555_v22, %v63_v38  ;;  %v303_v35 = vrot.slane %v301_v34, 1  ;;  %v337_v36 = vstv %s394_s8 }
  0x9b   :  { %424 = vpow2.f32 %v381_v39  ;;  %v338_v38 = vmul.f32 %v337_v36, %v301_v34  ;;  %v311_v39 = vstv %s307_s9 }
  0x9c   :  { %426 = vpow2.f32 %v382_v40  ;;  %v107_v45 = vpop.permute.xlu1 %106  ;;  %v102_v46 = vpop.permute.xlu0 %101  ;;  %v305_v37 = vadd.f32 %v303_v35, %v301_v34  ;;  %v343_v40 = vstv %s575_s10 }
  0x9d   :  { %v115_v47 = vadd.f32 %v107_v45, %v87_v41  ;;  %v116_v48 = vadd.f32 %v107_v45, %v88_v42  ;;  %v113_v49 = vadd.f32 %v102_v46, %v85_v43  ;;  %v114_v50 = vadd.f32 %v102_v46, %v86_v44 }
  0x9e   :  { %v306_v41 = vmul.f32 0.5, %v305_v37  ;;  %v312_v42 = vmul.f32 %v311_v39, %v301_v34  ;;  %v340_v43 = vrot.slane %v338_v38, 2  ;;  %v344_v44 = vmul.f32 %v343_v40, %v301_v34 }
  0x9f   :  { %v385_v51 = vmul.f32 -1.442695, %v115_v47  ;;  %v386_v52 = vmul.f32 -1.442695, %v116_v48  ;;  %v383_v53 = vmul.f32 -1.442695, %v113_v49  ;;  %v317_v45 = vstv %s393_s13 }
  0xa0   :  { %v384_v57 = vmul.f32 -1.442695, %v114_v50  ;;  %v173_v9 = vpop.permute.xlu1 %172  ;;  %v168_v10 = vpop.permute.xlu0 %167  ;;  %v314_v47 = vrot.slane %v312_v42, 2  ;;  %v318_v48 = vmul.f32 %v317_v45, %v301_v34  ;;  %v342_v49 = vadd.f32 %v340_v43, %v306_v41 }
  0xa1   :  { %v421_v54 = vpop.eup %420  ;;  %428 = vpow2.f32 %v385_v51  ;;  %v178_v17 = vmul.f32 %v173_v9, %v555_v22  ;;  %v176_v18 = vmul.f32 %v168_v10, %v555_v22  ;;  %v177_v26 = vmul.f32 %v173_v9, %v553_v21 }
  0xa2   :  { %v423_v55 = vpop.eup %422  ;;  %v141_v56 = vadd.f32 1.0, %v421_v54  ;;  %430 = vpow2.f32 %v386_v52  ;;  %v175_v27 = vmul.f32 %v168_v10, %v553_v21  ;;  %v469_v22 = vmov 1.0|1.0   ;;  %v201_v21 = vld [vmem:[%s600_s2] sm:$0xff]  ;;  %s349_s2 = smul.f32 %s394_s8, %s394_s8 }
  0xa3   :  { %v142_v58 = vadd.f32 1.0, %v423_v55  ;;  %432 = vpow2.f32 %v383_v53  ;;  %v346_v50 = vrot.slane %v344_v44, 3  ;;  %v324_v51 = vstv %s323_s14 }
  0xa4   :  { %434 = vrcp.f32 %v141_v56  ;;  %v187_v15 = vpop.permute.xlu1 %186  ;;  %v182_v16 = vpop.permute.xlu0 %181  ;;  %v350_v46 = vstv %s349_s2  ;;  %v316_v53 = vadd.f32 %v314_v47, %v306_v41  ;;  %v320_v54 = vrot.slane %v318_v48, 3 }
  0xa5   :  { %v425_v59 = vpop.eup %424  ;;  %436 = vpow2.f32 %v384_v57  ;;  %v192_v23 = vadd.f32 %v187_v15, %v178_v17  ;;  %v190_v24 = vadd.f32 %v182_v16, %v176_v18  ;;  %v191_v29 = vadd.f32 %v187_v15, %v177_v26 }
  0xa6   :  { %v427_v60 = vpop.eup %426  ;;  %v143_v61 = vadd.f32 1.0, %v425_v59  ;;  %438 = vrcp.f32 %v142_v58  ;;  %v189_v30 = vadd.f32 %v182_v16, %v175_v27  ;;  %v351_v52 = vmul.f32 %v350_v46, %v301_v34 }
  0xa7   :  { %v144_v62 = vadd.f32 1.0, %v427_v60  ;;  %vm196_vm0 = vcmp.gt.f32.partialorder %v192_v23, 0.0  ;;  %vm194_vm1 = vcmp.gt.f32.partialorder %v190_v24, 0.0  ;;  %vm195_vm2 = vcmp.gt.f32.partialorder %v191_v29, 0.0 }
  0xa8   :  { %440 = vrcp.f32 %v143_v61  ;;  %vm193_vm3 = vcmp.gt.f32.partialorder %v189_v30, 0.0  ;;  %vm404_vm4 = vmpackc.low %vm196_vm0, %vm194_vm1  ;;  %v325_v55 = vmul.f32 %v324_v51, %v301_v34  ;;  %v348_v56 = vadd.f32 %v346_v50, %v342_v49  ;;  %v206_v9 = vpop.permute.xlu0 %205 }
  0xa9   :  { %442 = vrcp.f32 %v144_v62  ;;  %vm406_vm5 = vmpackc.low %vm195_vm2, %vm193_vm3  ;;  %v331_v57 = vstv %s330_s15  ;;  %v353_v58 = vrot.slane %v351_v52, 4  ;;  %v357_v59 = vstv %s356_s3 }
  0xaa   :  { %v322_v60 = vadd.f32 %v320_v54, %v316_v53  ;;  %v327_v61 = vrot.slane %v325_v55, 4  ;;  %v332_v62 = vmul.f32 %v331_v57, %v301_v34 }
  0xab   :  { %v429_v63 = vpop.eup %428 }
  0xac   :  { %v431_v0 = vpop.eup %430  ;;  %v147_v1 = vadd.f32 1.0, %v429_v63  ;;  %v358_v63 = vmul.f32 %v357_v59, %v301_v34 }
  0xad   :  { %v433_v2 = vpop.eup %432  ;;  %v148_v3 = vadd.f32 1.0, %v431_v0  ;;  %v355_v0 = vadd.f32 %v353_v58, %v348_v56 }
  0xae   :  { %v145_v4 = vadd.f32 1.0, %v433_v2  ;;  %v435_v5 = vpop.eup %434  ;;  %444 = vrcp.f32 %v147_v1  ;;  %v329_v1 = vadd.f32 %v327_v61, %v322_v60  ;;  %v334_v2 = vrot.slane %v332_v62, 5 }
  0xaf   :  { %v437_v6 = vpop.eup %436 }
  0xb0   :  { %446 = vrcp.f32 %v145_v4  ;;  %v439_v7 = vpop.eup %438  ;;  %v146_v8 = vadd.f32 1.0, %v437_v6  ;;  %v336_v4 = vadd.f32 %v334_v2, %v329_v1 }
  0xb1   :  { %448 = vrcp.f32 %v148_v3  ;;  %v360_v3 = vrot.slane %v358_v63, 5 }
  0xb2   :  { %v441_v11 = vpop.eup %440  ;;  %450 = vrcp.f32 %v146_v8  ;;  %v211_v8 = vpop.permute.xlu1 %210 }
  0xb3   :  { %v443_v12 = vpop.eup %442  ;;  %v398_v13 = vpack.c.bf16 %v441_v11, %v435_v5  ;;  %v362_v5 = vadd.f32 %v360_v3, %v355_v0 }
  0xb4   :  { %v396_v14 = vpack.c.bf16 %v443_v12, %v439_v7 }
  0xb5   :  { %v364_v6 = vrot.slane %v362_v5, 7 }
  0xb6   :  { %397 = vmatprep.subr.bf16.mxu0 %v396_v14  ;;  %408 = vmatprep.subr.bf16.mxu1 %v396_v14 }
  0xb7   :  { %399 = vmatpush1.bf16.msra.mxu0 %v398_v13  ;;  %411 = vmatpush1.bf16.msra.mxu1 %v398_v13  ;;  %v367_v7 = vsel %vm366_vm7, %v336_v4, %v364_v6 }
  0xb8   :  { %v445_v19 = vpop.eup %444  ;;  %369 = vst.msk [vmem:[%s604_s6] sm:$0x3] %vm368_vm8, %v367_v7 }
  0xba   :  { %v447_v20 = vpop.eup %446 }
  0xbb   :  { %v449_v25 = vpop.eup %448  ;;  %v402_v31 = vpack.c.bf16 %v445_v19, %v447_v20 }
  0xbc   :  { %v451_v28 = vpop.eup %450 }
  0xbd   :  { %v400_v32 = vpack.c.bf16 %v449_v25, %v451_v28 }
  0xbf   :  { %401 = vmatprep.subr.bf16.mxu0 %v400_v32  ;;  %409 = vmatprep.subr.bf16.mxu1 %v400_v32 }
  0xc0   :  { %403 = vmatpush1.bf16.msra.mxu0 %v402_v31  ;;  %412 = vmatpush1.bf16.msra.mxu1 %v402_v31 }
  0xc1   :  { %405 = vmatprep.subr.msk.bf16.mxu0 %vm404_vm4, %v469_v22  ;;  %410 = vmatprep.subr.msk.bf16.mxu1 %vm404_vm4, %v469_v22 }
  0xc4   :  { %407 = vmatpush1.bf16.msk.msra.mxu0 %vm406_vm5, %v469_v22  ;;  %413 = vmatpush1.bf16.msk.msra.mxu1 %vm406_vm5, %v469_v22 }
  0xc7   :  { %391 = vmatmul.mubr.msk.f32.vlgmr.msra.gmra.mrb[0].mxu0 %vm213_vm6, %v201_v21  ;;  %392 = vmatmul.mubr.msk.f32.vlgmr.msra.gmra.mrb[0].mxu1 %vm213_vm6, %v202_v33 }
 0x19a   :  { %v286_v10 = vpop.f32.mrb[0].mxu0  ;;  %v292_v11 = vpop.f32.mrb[0].mxu1 }
 0x19b   :  { %v287_v12 = vadd.f32 %v286_v10, %v206_v9  ;;  %v293_v13 = vadd.f32 %v292_v11, %v211_v8  ;;  %v288_v14 = vpop.f32.mrb[1].mxu0  ;;  %v294_v15 = vpop.f32.mrb[1].mxu1 }
 0x19c   :  { %v289_v16 = vadd.f32 %v288_v14, %v206_v9  ;;  %v295_v17 = vadd.f32 %v294_v15, %v211_v8 }
 0x19d   :  { %297 = vst [vmem:[%s603_s5] sm:$0xff] %v287_v12  ;;  %299 = vst [vmem:[%s603_s5 + $0x10] sm:$0xff] %v293_v13 }
 0x19e   :  { %298 = vst [vmem:[%s603_s5 + $0x8] sm:$0xff] %v289_v16  ;;  %300 = vst [vmem:[%s603_s5 + $0x18] sm:$0xff] %v295_v17 }
 0x19f   :  { %378 = vsyncpa [#allocation3], 1 }

</bundles_post_ra>
